<compile_context>
chip_gen: v7x
topology: tpu7x:2x2x1
jax: 0.10.0
libtpu: 0.0.40
codegen_flags: <defaults>
</compile_context>

<pallas_src>
import functools

import jax
import jax.numpy as jnp
from jax import lax
from jax.experimental import pallas as pl
from jax.experimental.pallas import tpu as pltpu


def _focal_loss_kernel(x_ref, t_ref, o_ref, acc_ref, *,
                       gamma, size_average, total_rows, hw, tile_hw, needs_mask):
    ni = pl.program_id(0)
    ji = pl.program_id(1)
    first = jnp.logical_and(ni == 0, ji == 0)
    last = jnp.logical_and(ni == pl.num_programs(0) - 1,
                           ji == pl.num_programs(1) - 1)

    @pl.when(first)
    def _():
        acc_ref[...] = jnp.zeros_like(acc_ref)

    x = x_ref[0].astype(jnp.float32)                     # [C, tile_hw]
    # log_softmax over the class (sublane) axis == PyTorch dim=1 on [M, C].
    m = jnp.max(x, axis=0, keepdims=True)
    z = x - m
    lse = jnp.log(jnp.sum(jnp.exp(z), axis=0, keepdims=True))
    logp = z - lse                                       # [C, tile_hw]

    t = t_ref[0]                                         # [1, tile_hw] int32
    cls = lax.broadcasted_iota(jnp.int32, logp.shape, 0)
    onehot = cls == t                                    # gather(1, target)
    logpt = jnp.sum(jnp.where(onehot, logp, 0.0), axis=0, keepdims=True)  # [1, thw]
    pt = jnp.exp(logpt)

    # Focal weight, specialized at trace time (gamma is a Python constant).
    g = float(gamma)
    if g == 0.0:
        w = 1.0
    elif g.is_integer() and 1.0 <= g <= 8.0:
        omp = 1.0 - pt
        w = omp
        for _ in range(int(g) - 1):
            w = w * omp
    else:
        w = (1.0 - pt) ** g
    loss = -(w * logpt)                                  # [1, tile_hw]

    if needs_mask:
        # Mask the ragged tail of the last lane tile (garbage columns beyond hw
        # are column-local, so zeroing them here is sufficient).
        pix = ji * tile_hw + lax.broadcasted_iota(jnp.int32, loss.shape, 1)
        loss = jnp.where(pix < hw, loss, 0.0)

    acc_ref[...] += loss                                 # lane-wide partial sums

    @pl.when(last)
    def _():
        s = jnp.sum(acc_ref[...], axis=-1, keepdims=True)  # one cross-lane reduce
        if size_average:
            s = s / jnp.float32(total_rows)
        o_ref[...] = s


def _round_up(v, m):
    return ((v + m - 1) // m) * m


def _choose_tile_hw(num_classes, hw, itemsize, max_block_bytes):
    """Largest lane tile (multiple of 128) whose logits block stays under
    max_block_bytes (double-buffered by the pipeline; leaves headroom for the
    64 MiB VMEM on v7x)."""
    full = _round_up(hw, 128)
    per_lane = max(1, num_classes * itemsize)
    cap = max(128, (max_block_bytes // per_lane) // 128 * 128)
    return int(min(full, cap))


def focal_loss(logits, target, *, gamma=0, size_average=False,
               max_block_bytes=2 * 1024 * 1024):
    """Pallas implementation of FocalLoss.forward.

    logits: [N, C] or [N, C, *spatial] (NCHW-style, like the PyTorch module).
    target: integer class indices with N * prod(spatial) (or N) elements.
    Returns a scalar float32 loss (sum over rows, or mean if size_average).
    """
    x = logits
    if x.ndim > 2:
        n, c = x.shape[0], x.shape[1]
        x = x.reshape(n, c, -1)                     # [N, C, HW]: free reshape
    else:
        # Plain [M, C]: one transpose so pixels land on the lane axis.
        m_rows, c = x.shape
        x = jnp.transpose(x, (1, 0)).reshape(1, c, m_rows)
    n_b, num_classes, hw = x.shape
    total_rows = n_b * hw

    t = target.reshape(n_b, 1, hw).astype(jnp.int32)     # lane-dense targets

    tile_hw = _choose_tile_hw(num_classes, hw,
                              jnp.dtype(x.dtype).itemsize, max_block_bytes)
    num_hw_tiles = pl.cdiv(hw, tile_hw)
    needs_mask = (num_hw_tiles * tile_hw != hw)

    kernel = functools.partial(
        _focal_loss_kernel,
        gamma=float(gamma),
        size_average=bool(size_average),
        total_rows=int(total_rows),
        hw=int(hw),
        tile_hw=int(tile_hw),
        needs_mask=bool(needs_mask),
    )

    # TODO(synk): on v7x, add a leading "parallel" core axis with per-core
    # partial-sum outputs to use both TensorCores; kept single-core here so the
    # shared (1, 1) accumulator stays race-free on every generation.
    out = pl.pallas_call(
        kernel,
        out_shape=jax.ShapeDtypeStruct((1, 1), jnp.float32),
        grid_spec=pltpu.PrefetchScalarGridSpec(
            num_scalar_prefetch=0,
            grid=(n_b, num_hw_tiles),
            in_specs=[
                pl.BlockSpec((1, num_classes, tile_hw), lambda ni, ji: (ni, 0, ji)),
                pl.BlockSpec((1, 1, tile_hw), lambda ni, ji: (ni, 0, ji)),
            ],
            out_specs=pl.BlockSpec((1, 1), lambda ni, ji: (0, 0)),
            scratch_shapes=[pltpu.VMEM((1, tile_hw), jnp.float32)],
        ),
        compiler_params=pltpu.CompilerParams(
            dimension_semantics=("arbitrary", "arbitrary"),
        ),
    )(x, t)
    return out[0, 0]


def _focal_loss_ref(logits, target, gamma=0, size_average=False):
    """Pure-JAX reference mirroring the PyTorch module."""
    x = logits
    if x.ndim > 2:
        n, c = x.shape[0], x.shape[1]
        x = jnp.transpose(x.reshape(n, c, -1), (0, 2, 1)).reshape(-1, c)
    x = x.astype(jnp.float32)
    t = target.reshape(-1)
    logp = jax.nn.log_softmax(x, axis=1)
    logpt = jnp.take_along_axis(logp, t[:, None], axis=1)[:, 0]
    pt = jnp.exp(logpt)
    loss = -((1.0 - pt) ** gamma) * logpt
    return loss.mean() if size_average else loss.sum()


if __name__ == "__main__":
    key = jax.random.PRNGKey(0)
    k_x, k_t = jax.random.split(key)

    # NCHW logits, semantic-segmentation style: batch=2, classes=4, 16x16.
    N, C, H, W = 2, 4, 16, 16
    x = jax.random.normal(k_x, (N, C, H, W), dtype=jnp.float32)
    target = jax.random.randint(k_t, (N, H, W), 0, C, dtype=jnp.int32)

    # gamma=2, sum (exercises the focal weighting).
    out = jax.block_until_ready(focal_loss(x, target, gamma=2, size_average=False))
    ref = _focal_loss_ref(x, target, gamma=2, size_average=False)
    assert jnp.allclose(out, ref, rtol=1e-5, atol=1e-5), (out, ref)

    # Default-constructor path (gamma=0, sum).
    out0 = jax.block_until_ready(focal_loss(x, target))
    ref0 = _focal_loss_ref(x, target)
    assert jnp.allclose(out0, ref0, rtol=1e-5, atol=1e-5), (out0, ref0)

    # size_average=True -> mean.
    outm = jax.block_until_ready(focal_loss(x, target, gamma=2, size_average=True))
    refm = _focal_loss_ref(x, target, gamma=2, size_average=True)
    assert jnp.allclose(outm, refm, rtol=1e-5, atol=1e-5), (outm, refm)

    # Ragged spatial size (H*W not a multiple of 128) -> in-kernel tail mask.
    Hr, Wr = 10, 10
    xr = jax.random.normal(k_x, (N, C, Hr, Wr), dtype=jnp.float32)
    tr = jax.random.randint(k_t, (N, Hr, Wr), 0, C, dtype=jnp.int32)
    outr = jax.block_until_ready(focal_loss(xr, tr, gamma=2))
    refr = _focal_loss_ref(xr, tr, gamma=2)
    assert jnp.allclose(outr, refr, rtol=1e-5, atol=1e-5), (outr, refr)

    # Plain 2-D [M, C] path, non-integer gamma (pow fallback).
    M2, C2 = 64, 10
    x2 = jax.random.normal(k_x, (M2, C2), dtype=jnp.float32)
    t2 = jax.random.randint(k_t, (M2,), 0, C2, dtype=jnp.int32)
    out2 = jax.block_until_ready(focal_loss(x2, t2, gamma=0.5))
    ref2 = _focal_loss_ref(x2, t2, gamma=0.5)
    assert jnp.allclose(out2, ref2, rtol=1e-5, atol=1e-5), (out2, ref2)

    print("KERNEL_OK")
</pallas_src>

<mosaic_0001>
module attributes {stable_mosaic.version = 11 : i64} {
  func.func @_focal_loss_kernel(%arg0: i32, %arg1: i32, %arg2: memref<1x4x256xf32, #tpu.memory_space<vmem>>, %arg3: memref<1x1x256xi32, #tpu.memory_space<vmem>>, %arg4: memref<1x1xf32, #tpu.memory_space<vmem>>, %arg5: memref<1x256xf32, #tpu.memory_space<vmem>>) attributes {dimension_semantics = [#tpu.dimension_semantics<arbitrary>, #tpu.dimension_semantics<arbitrary>], iteration_bounds = array<i64: 2, 1>, scalar_prefetch = 0 : i64, scratch_operands = 1 : i64, tpu.core_type = #tpu.core_type<tc>, window_params = [{transform_indices = @transform_0, window_bounds = array<i64: 1, 4, 256>}, {transform_indices = @transform_1, window_bounds = array<i64: 1, 1, 256>}, {pipeline_mode = #tpu.pipeline_mode<synchronous>, transform_indices = @transform_2, window_bounds = array<i64: 1, 1>}]} {
    %c0_i32 = arith.constant 0 : i32
    %0 = arith.cmpi eq, %arg0, %c0_i32 : i32
    %c0_i32_0 = arith.constant 0 : i32
    %1 = arith.cmpi eq, %arg1, %c0_i32_0 : i32
    %2 = arith.andi %0, %1 : i1
    %c1_i32 = arith.constant 1 : i32
    %3 = arith.cmpi eq, %arg0, %c1_i32 : i32
    %c0_i32_1 = arith.constant 0 : i32
    %4 = arith.cmpi eq, %arg1, %c0_i32_1 : i32
    %5 = arith.andi %3, %4 : i1
    %6 = arith.extui %2 : i1 to i32
    %c0_i32_2 = arith.constant 0 : i32
    %7 = arith.cmpi ne, %6, %c0_i32_2 : i32
    scf.if %7 {
      %cst_18 = arith.constant 0.000000e+00 : f32
      %41 = vector.broadcast %cst_18 : f32 to vector<1x256xf32>
      %c0_19 = arith.constant 0 : index
      %c0_20 = arith.constant 0 : index
      %42 = vector.load %arg5[%c0_19, %c0_20] : memref<1x256xf32, #tpu.memory_space<vmem>>, vector<1x256xf32>
      tpu.vector_store %arg5[%c0_19, %c0_20], %41 {strides = array<i32>} : memref<1x256xf32, #tpu.memory_space<vmem>>, vector<1x256xf32>,
    } else {
    }
    %c0 = arith.constant 0 : index
    %c0_3 = arith.constant 0 : index
    %c0_4 = arith.constant 0 : index
    %8 = vector.load %arg2[%c0, %c0_3, %c0_4] : memref<1x4x256xf32, #tpu.memory_space<vmem>>, vector<1x4x256xf32>
    %9 = vector.shape_cast %8 : vector<1x4x256xf32> to vector<4x256xf32>
    %cst = arith.constant dense<0xFF800000> : vector<256xf32>
    %10 = vector.multi_reduction <maximumf>, %9, %cst [0] : vector<4x256xf32> to vector<256xf32>
    %11 = vector.shape_cast %10 : vector<256xf32> to vector<1x256xf32>
    %12 = vector.broadcast %11 : vector<1x256xf32> to vector<4x256xf32>
    %13 = arith.subf %9, %12 : vector<4x256xf32>
    %14 = math.exp %13 : vector<4x256xf32>
    %cst_5 = arith.constant dense<0.000000e+00> : vector<256xf32>
    %15 = vector.multi_reduction <add>, %14, %cst_5 [0] : vector<4x256xf32> to vector<256xf32>
    %16 = vector.shape_cast %15 : vector<256xf32> to vector<1x256xf32>
    %17 = math.log %16 : vector<1x256xf32>
    %18 = vector.broadcast %17 : vector<1x256xf32> to vector<4x256xf32>
    %19 = arith.subf %13, %18 : vector<4x256xf32>
    %c0_6 = arith.constant 0 : index
    %c0_7 = arith.constant 0 : index
    %c0_8 = arith.constant 0 : index
    %20 = vector.load %arg3[%c0_6, %c0_7, %c0_8] : memref<1x1x256xi32, #tpu.memory_space<vmem>>, vector<1x1x256xi32>
    %21 = vector.shape_cast %20 : vector<1x1x256xi32> to vector<1x256xi32>
    %22 = tpu.iota {dimensions = array<i32: 0>} : vector<4x256xi32>
    %23 = vector.broadcast %21 : vector<1x256xi32> to vector<4x256xi32>
    %24 = arith.cmpi eq, %22, %23 : vector<4x256xi32>
    %cst_9 = arith.constant 0.000000e+00 : f32
    %25 = vector.broadcast %cst_9 : f32 to vector<4x256xf32>
    %26 = arith.select %24, %19, %25 : vector<4x256xi1>, vector<4x256xf32>
    %cst_10 = arith.constant dense<0.000000e+00> : vector<256xf32>
    %27 = vector.multi_reduction <add>, %26, %cst_10 [0] : vector<4x256xf32> to vector<256xf32>
    %28 = vector.shape_cast %27 : vector<256xf32> to vector<1x256xf32>
    %29 = math.exp %28 : vector<1x256xf32>
    %cst_11 = arith.constant 1.000000e+00 : f32
    %30 = vector.broadcast %cst_11 : f32 to vector<1x256xf32>
    %31 = arith.subf %30, %29 : vector<1x256xf32>
    %32 = arith.mulf %31, %31 : vector<1x256xf32>
    %33 = arith.mulf %32, %28 : vector<1x256xf32>
    %cst_12 = arith.constant 0.000000e+00 : f32
    %34 = vector.broadcast %cst_12 : f32 to vector<1x256xf32>
    %35 = arith.subf %34, %33 : vector<1x256xf32>
    %c0_13 = arith.constant 0 : index
    %c0_14 = arith.constant 0 : index
    %36 = vector.load %arg5[%c0_13, %c0_14] : memref<1x256xf32, #tpu.memory_space<vmem>>, vector<1x256xf32>
    %37 = arith.addf %36, %35 : vector<1x256xf32>
    %c0_15 = arith.constant 0 : index
    %c0_16 = arith.constant 0 : index
    %38 = vector.load %arg5[%c0_15, %c0_16] : memref<1x256xf32, #tpu.memory_space<vmem>>, vector<1x256xf32>
    tpu.vector_store %arg5[%c0_15, %c0_16], %37 {strides = array<i32>} : memref<1x256xf32, #tpu.memory_space<vmem>>, vector<1x256xf32>,
    %39 = arith.extui %5 : i1 to i32
    %c0_i32_17 = arith.constant 0 : i32
    %40 = arith.cmpi ne, %39, %c0_i32_17 : i32
    scf.if %40 {
      %c0_18 = arith.constant 0 : index
      %c0_19 = arith.constant 0 : index
      %41 = vector.load %arg5[%c0_18, %c0_19] : memref<1x256xf32, #tpu.memory_space<vmem>>, vector<1x256xf32>
      %cst_20 = arith.constant dense<0.000000e+00> : vector<1xf32>
      %42 = vector.multi_reduction <add>, %41, %cst_20 [1] : vector<1x256xf32> to vector<1xf32>
      %43 = vector.shape_cast %42 : vector<1xf32> to vector<1x1xf32>
      %c0_21 = arith.constant 0 : index
      %c0_22 = arith.constant 0 : index
      %44 = vector.load %arg4[%c0_21, %c0_22] : memref<1x1xf32, #tpu.memory_space<vmem>>, vector<1x1xf32>
      tpu.vector_store %arg4[%c0_21, %c0_22], %43 {strides = array<i32>} : memref<1x1xf32, #tpu.memory_space<vmem>>, vector<1x1xf32>,
    } else {
    }
    return
  }
  func.func @transform_0(%arg0: i32, %arg1: i32) -> (i32, i32, i32) {
    %c0_i32 = arith.constant 0 : i32
    %c0_i32_0 = arith.constant 0 : i32
    return %arg0, %c0_i32, %arg1 : i32, i32, i32
  }
  func.func @transform_1(%arg0: i32, %arg1: i32) -> (i32, i32, i32) {
    %c0_i32 = arith.constant 0 : i32
    %c0_i32_0 = arith.constant 0 : i32
    return %arg0, %c0_i32, %arg1 : i32, i32, i32
  }
  func.func @transform_2(%arg0: i32, %arg1: i32) -> (i32, i32) {
    %c0_i32 = arith.constant 0 : i32
    %c0_i32_0 = arith.constant 0 : i32
    %c0_i32_1 = arith.constant 0 : i32
    return %c0_i32, %c0_i32_0 : i32, i32
  }
}

</mosaic_0001>

<bundles_post_ra>
// kernel: tpu_custom_call.1
= control target key start
LH: loop header
LB: loop body
LE: loop exit
PB: predicated region body
PF: predicated region fallthrough
CT: control target
= control target key end

     0   :  { %7 = vsyncpa [#allocation4], 0  ;;  %s932_s0 = inlined_call_operand.hbm [shape: f32[2,4,256], index: 0, kind: input, shape index: {}]   ;;  %s933_s1 = inlined_call_operand.hbm [shape: s32[2,1,256], index: 1, kind: input, shape index: {}]   ;;  %s934_s2 = inlined_call_operand.hbm [shape: f32[1,1], index: 2, kind: output, shape index: {}]  }
   0x1   :  { %9 = vsyncpa [#allocation4 + $0x1], 0 }
   0x2   :  { %10 = vsyncpa [#allocation7], 0 }
   0x3   :  { %12 = vsyncpa [#allocation7 + $0x1], 0 }
   0x4   :  { %13 = vsyncpa [#allocation5], 0  ;;  %s728_s9 = smov 0   ;;  %s730_s10 = smov 0  }
   0x5   :  { %s732_s11 = smov 0   ;;  %s734_s12 = smov 0  }
   0x6   :  { %s736_s13 = smov 0   ;;  %s738_s14 = smov 0  }
   0x7 LB: > { %s460_s15 = sadd.s32 4294967295, %s706_s14   ;;  %s31_s16 = sadd.s32 1, %s702_s13  ;;  %s706_s14 = sphi %s738_s14, %s19_s14   ;;  %s702_s13 = sphi %s736_s13, %s949_s13   ;;  %s698_s12 = sphi %s734_s12, %s948_s12   ;;  %s694_s11 = sphi %s732_s11, %s947_s11   ;;  %s690_s10 = sphi %s730_s10, %s946_s10   ;;  %s686_s9 = sphi %s728_s9, %s945_s9  }
   0x8   : > { %p33_p0 = scmp.ge.s32.totalorder %s31_s16, 2  ;;  %s40_s17 = sadd.s32 1, %s694_s11 }
   0x9   : > { %p47_p1 = scmp.ne.s32.totalorder %s694_s11, %s690_s10  ;;  %p48_p2 = scmp.eq.s32.totalorder %s706_s14, 0 }
   0xa   : > { %s951_s16 = smov (%p33_p0, %s31_s16), 0  ;;  %p53_p4 = scmp.ne.s32.totalorder %s690_s10, %s686_s9 }
   0xb   : > { %p764_p3 = por %p48_p2, %p47_p1  ;;  %s35_s19 = ssub.s32 %s702_s13, %s951_s16 }
   0xc   : > { %p54_p5 = scmp.eq.s32.totalorder %s460_s15, 0  ;;  %p38_p6 = scmp.eq.s32.totalorder %s35_s19, 0 }
   0xd   : > { %p497_p8 = scmp.lt.s32.totalorder %s706_s14, 2  ;;  %s782_s22 = sand.u32 1, %s694_s11  }
   0xe   : > { %p773_p7 = por %p54_p5, %p53_p4  ;;  %s478_s23 = sshll.u32 %s702_s13, 7 }
   0xf   : > { %s779_s21 = scalar_select %p38_p6, %s694_s11, %s40_s17  }
  0x10   : > { %s937_s20 = scalar_select %p773_p7, 1, 0 }
  0x11   : > { %s463_s24 = sshll.u32 %s782_s22, 3  ;;  %s789_s27 = scalar_lea.hbm %s932_s0, %s478_s23 }
  0x12   : > { %s130_s28 = scalar_lea.vmem [#allocation3], %s463_s24  ;;  %p793_p9 = pnand %p497_p8, %p764_p3 }
  0x13   : > { %s140_s29 = sshll.u32 %s130_s28, 4  ;;  %s127_s3 = scalar_lea.sflag [#allocation4], %s782_s22  ;;  %s797_s29 = int_to_ptr.vmem [resolvable:$true] %s140_s29 }
  0x14   : > { %s562_s4 = scalar_lea.hbm %s789_s27, 128  ;;  %p564_p13 = pneg %p793_p9 }
  0x15   : > { %p563_p12 = scmp.ne.s32.totalorder %s789_s27, %s562_s4  ;;  %s567_s7 = scalar_lea.hbm %s932_s0, 256 }
  0x16   : > { %p568_p2 = scmp.lt.u32.totalorder %s789_s27, %s932_s0  ;;  %p569_p3 = scmp.lt.u32.totalorder %s567_s7, %s562_s4 }
  0x17   : > { %p565_p0 = pnand %p564_p13, %p563_p12  ;;  %p571_p5 = scmp.lt.u32.totalorder %s562_s4, %s789_s27 }
  0x18   : > { %p570_p4 = por %p569_p3, %p568_p2 }
  0x19   : > { %p566_p1 = pneg %p565_p0 }
  0x1a   : > { %p572_p6 = por %p571_p5, %p570_p4 }
  0x1c   : > { %p573_p8 = pnand %p572_p6, %p566_p1 }
  0x1e   : > { %576 = shalt.err (!%p573_p8)
}
  0x1f   : > { %s577_s17 = scalar_lea.vmem %s797_s29, 128  ;;  %s708_s18 = smov [#allocation3]  }
  0x20   : > { %p578_p12 = scmp.ne.s32.totalorder %s797_s29, %s577_s17  ;;  %s582_s19 = sshll.u32 %s708_s18, 4  ;;  %s583_s19 = int_to_ptr.vmem [resolvable:$false] %s582_s19 }
  0x21   : > { %s584_s23 = scalar_lea.vmem %s583_s19, 256  ;;  %p585_p11 = scmp.lt.s32.totalorder %s797_s29, %s583_s19 }
  0x22   : > { %p580_p0 = pnand %p578_p12, %p564_p13  ;;  %p586_p2 = scmp.lt.s32.totalorder %s584_s23, %s577_s17 }
  0x24   : > { %p581_p10 = pneg %p580_p0  ;;  %p587_p3 = por %p586_p2, %p585_p11 }
  0x26   : > { %p588_p4 = pnand %p587_p3, %p581_p10 }
  0x28   : > { %591 = shalt.err (!%p588_p4)
}
  0x29   : > { %493 = dma.hbm_to_vmem [thread:$0]  (!%p793_p9), %s789_s27, 128, %s797_s29, %s127_s3  }
  0x2a   : > { %p939_p1 = scmp.lt.s32.totalorder %s706_s14, 3  ;;  %p940_p5 = scmp.ge.s32.totalorder %s706_s14, 1 }
  0x2b   : > { %s466_s25 = sshll.u32 %s782_s22, 1  ;;  %s479_s26 = sshll.u32 %s702_s13, 5 }
  0x2c   : > { %p831_p6 = pnand %p940_p5, %p939_p1  ;;  %s840_s5 = scalar_lea.hbm %s933_s1, %s479_s26 }
  0x2d   : > { %s151_s6 = scalar_lea.vmem [#allocation6], %s466_s25  ;;  %s148_s27 = scalar_lea.sflag [#allocation7], %s782_s22 }
  0x2e   : > { %s941_s24 = scalar_select %p831_p6, 1, 0 }
  0x2f   : > { %s161_s7 = sshll.u32 %s151_s6, 4  ;;  %s592_s29 = scalar_lea.hbm %s840_s5, 32  ;;  %s162_s7 = int_to_ptr.vmem [resolvable:$true] %s161_s7 }
  0x30   : > { %p593_p10 = scmp.ne.s32.totalorder %s840_s5, %s592_s29  ;;  %s597_s9 = scalar_lea.hbm %s933_s1, 64 }
  0x31   : > { %p598_p12 = scmp.lt.u32.totalorder %s840_s5, %s933_s1  ;;  %p599_p0 = scmp.lt.u32.totalorder %s597_s9, %s592_s29 }
  0x32   : > { %p595_p11 = pnand %p593_p10, %p564_p13  ;;  %p601_p3 = scmp.lt.u32.totalorder %s592_s29, %s840_s5 }
  0x33   : > { %p600_p2 = por %p599_p0, %p598_p12 }
  0x34   : > { %p596_p8 = pneg %p595_p11 }
  0x35   : > { %p602_p4 = por %p601_p3, %p600_p2 }
  0x37   : > { %p603_p1 = pnand %p602_p4, %p596_p8 }
  0x39   : > { %606 = shalt.err (!%p603_p1)
}
  0x3a   : > { %s607_s22 = scalar_lea.vmem %s162_s7, 32  ;;  %s709_s19 = smov [#allocation6]  }
  0x3b   : > { %p608_p5 = scmp.ne.s32.totalorder %s162_s7, %s607_s22  ;;  %s612_s23 = sshll.u32 %s709_s19, 4  ;;  %s613_s23 = int_to_ptr.vmem [resolvable:$false] %s612_s23 }
  0x3c   : > { %s614_s25 = scalar_lea.vmem %s613_s23, 64  ;;  %p615_p7 = scmp.lt.s32.totalorder %s162_s7, %s613_s23 }
  0x3d   : > { %p610_p10 = pnand %p608_p5, %p564_p13  ;;  %p616_p6 = scmp.lt.s32.totalorder %s614_s25, %s607_s22 }
  0x3f   : > { %p611_p11 = pneg %p610_p10  ;;  %p617_p0 = por %p616_p6, %p615_p7 }
  0x41   : > { %p618_p12 = pnand %p617_p0, %p611_p11 }
  0x43   : > { %621 = shalt.err (!%p618_p12)
}
  0x44   : > { %496 = dma.hbm_to_vmem [thread:$0]  (!%p793_p9), %s840_s5, 32, %s162_s7, %s148_s27  }
  0x45   : > { %p942_p8 = scmp.ne.s32.totalorder %s941_s24, 0 }
  0x46   : > { %s172_s26 = sand.u32 (!%p942_p8), 1, %s690_s10   ;;  %p943_p13 = scmp.ne.s32.totalorder (!%p942_p8), %s937_s20, 0 }
  0x47   : > { %170 = sbr.rel (%p942_p8) target bundleno = 382 (0x17e), region = 28  ;;  %s470_s28 = sshll.u32 (!%p942_p8), %s172_s26, 3 }
  0x48   : > { %s173_s4 = scalar_lea.sflag (!%p942_p8), [#allocation4], %s172_s26  ;;  %s176_s6 = scalar_lea.vmem (!%p942_p8), [#allocation3], %s470_s28 }
  0x4e   : > { %673 = dma.done.wait (%p943_p13), %s173_s4, 128  }
  0x4f   : > { %675 = vsyncadd (%p943_p13), %s173_s4, 4294967168  ;;  %s471_s29 = sshll.u32 %s172_s26, 1  ;;  %s182_s3 = scalar_lea.sflag [#allocation7], %s172_s26 }
  0x50   : > { %s869_s30 = scalar_lea.vmem [#allocation6], %s471_s29 }
  0x51   : > { %677 = dma.done.wait (%p943_p13), %s182_s3, 32  }
  0x52   : > { %679 = vsyncadd (%p943_p13), %s182_s3, 4294967264  ;;  %p208_p7 = scmp.eq.s32.totalorder %s698_s12, 0  ;;  %p212_p9 = scmp.eq.s32.totalorder %s698_s12, 1 }
  0x53   : > { %v217_v0 = vlaneseq (%p208_p7)  ;;  %v710_v1 = vmov (%p208_p7), 0.0  }
  0x54   : > { %216 = sbr.rel (!%p208_p7) target bundleno = 91 (0x5b), region = 40 }
  0x55   : > { %vm219_vm0 = vcmp.lt.s32.totalorder (%p208_p7), %v217_v0, 256 }
  0x56   : > { %221 = vst.msk [vmem:[#allocation2] sm:$0x3] (%p208_p7), %vm219_vm0, %v710_v1 }
  0x5b PF: > { %v222_v2 = vld [vmem:[%s176_s6] sm:$0xff]  ;;  %vm226_vm1 = vcmask 1043456   ;;  %v275_v37 = vlaneseq  ;;  %v274_v40 = vld [vmem:[%s869_s30] sm:$0x3]  ;;  %vm357_vm5 = vcmask (%p212_p9), 1040384   ;;  %vm363_vm6 = vcmask (%p212_p9), 0  }
  0x5c   : > { %v224_v3 = vcombine.high %v222_v2, %v222_v2  ;;  %v227_v4 = vsel %vm226_vm1, %v222_v2, -inf }
  0x5d   : > { %v228_v5 = vrot.slane %v227_v4, 4  ;;  %v276_v38 = vshrl.u32 %v275_v37, 7  ;;  %vm340_vm4 = vcmp.lt.s32.totalorder %v275_v37, 256 }
  0x5e   : > { %v234_v6 = vsel %vm226_vm1, %v224_v3, -inf }
  0x5f   : > { %v229_v7 = vmax.f32 %v227_v4, %v228_v5  ;;  %v235_v8 = vrot.slane %v234_v6, 4  ;;  %v279_v39 = vsub.s32 0, %v276_v38  ;;  %v283_v42 = vsub.s32 1, %v276_v38 }
  0x61   : > { %v230_v9 = vrot.slane %v229_v7, 2  ;;  %v236_v10 = vmax.f32 %v234_v6, %v235_v8  ;;  %v280_v45 = vrot.slane %v274_v40, %v279_v39  ;;  %v284_v47 = vrot.slane %v274_v40, %v283_v42 }
  0x63   : > { %v231_v11 = vmax.f32 %v229_v7, %v230_v9  ;;  %v237_v12 = vrot.slane %v236_v10, 2  ;;  %vm285_vm2 = vcmp.eq.s32.totalorder %v276_v38, %v280_v45  ;;  %vm286_vm3 = vcmp.eq.s32.totalorder %v276_v38, %v284_v47 }
  0x64   : > { %v711_v7 = vmov 1966171168  }
  0x65   : > { %v232_v13 = vrot.slane %v231_v11, 1  ;;  %v238_v14 = vmax.f32 %v236_v10, %v237_v12  ;;  %v323_v8 = vunpack.c.l.s4 %v711_v7 }
  0x67   : > { %v233_v15 = vmax.f32 %v231_v11, %v232_v13  ;;  %v239_v16 = vrot.slane %v238_v14, 1 }
  0x69   : > { %v240_v17 = vmax.f32 %v238_v14, %v239_v16  ;;  %v324_v14 = vunpack.c.0.s8 %v323_v8 }
  0x6b   : > { %v243_v18 = vcombine.low %v233_v15, %v240_v17 }
  0x6d   : > { %v245_v19 = vsub.f32 %v222_v2, %v243_v18  ;;  %v327_v18 = vsub.s32 %v324_v14, %v276_v38 }
  0x6f   : > { %v246_v20 = vmul.f32 1.442695, %v245_v19 }
  0x71   : > { %552 = vpow2.f32 %v246_v20 }
  0x7b   : > { %v553_v21 = vpop.eup %552 }
  0x7c   : > { %v249_v22 = vcombine.high %v553_v21, %v553_v21  ;;  %v251_v23 = vsel %vm226_vm1, %v553_v21, 0.0  ;;  %v318_v21 = vld [vmem:[#allocation2] sm:$0x3] }
  0x7d   : > { %v252_v24 = vrot.slane %v251_v23, 4 }
  0x7e   : > { %v258_v25 = vsel %vm226_vm1, %v249_v22, 0.0 }
  0x7f   : > { %v253_v26 = vadd.f32 %v252_v24, %v251_v23  ;;  %v259_v27 = vrot.slane %v258_v25, 4 }
  0x81   : > { %v254_v28 = vrot.slane %v253_v26, 2  ;;  %v260_v29 = vadd.f32 %v259_v27, %v258_v25 }
  0x83   : > { %v255_v30 = vadd.f32 %v254_v28, %v253_v26  ;;  %v261_v31 = vrot.slane %v260_v29, 2 }
  0x85   : > { %v256_v32 = vrot.slane %v255_v30, 1  ;;  %v262_v33 = vadd.f32 %v261_v31, %v260_v29 }
  0x87   : > { %v257_v34 = vadd.f32 %v256_v32, %v255_v30  ;;  %v263_v35 = vrot.slane %v262_v33, 1 }
  0x89   : > { %v264_v36 = vadd.f32 %v263_v35, %v262_v33  ;;  %554 = vlog2.f32 %v257_v34 }
  0x8b   : > { %556 = vlog2.f32 %v264_v36 }
  0x93   : > { %v555_v41 = vpop.eup %554 }
  0x94   : > { %v266_v43 = vmul.f32 0.6931472, %v555_v41 }
  0x95   : > { %v557_v44 = vpop.eup %556 }
  0x96   : > { %v268_v46 = vmul.f32 0.6931472, %v557_v44 }
  0x98   : > { %v271_v48 = vcombine.low %v266_v43, %v268_v46 }
  0x9a   : > { %v273_v49 = vsub.f32 %v245_v19, %v271_v48 }
  0x9c   : > { %v288_v50 = vcombine.high %v273_v49, %v273_v49  ;;  %v290_v51 = vsel %vm285_vm2, %v273_v49, 0.0 }
  0x9d   : > { %v292_v52 = vsel %vm226_vm1, %v290_v51, 0.0 }
  0x9e   : > { %v291_v53 = vsel %vm286_vm3, %v288_v50, 0.0  ;;  %v293_v54 = vrot.slane %v292_v52, 4 }
  0x9f   : > { %v299_v55 = vsel %vm226_vm1, %v291_v53, 0.0 }
  0xa0   : > { %v294_v56 = vadd.f32 %v293_v54, %v292_v52  ;;  %v300_v57 = vrot.slane %v299_v55, 4 }
  0xa2   : > { %v295_v58 = vrot.slane %v294_v56, 2  ;;  %v301_v59 = vadd.f32 %v300_v57, %v299_v55 }
  0xa4   : > { %v296_v60 = vadd.f32 %v295_v58, %v294_v56  ;;  %v302_v61 = vrot.slane %v301_v59, 2 }
  0xa6   : > { %v297_v62 = vrot.slane %v296_v60, 1  ;;  %v303_v63 = vadd.f32 %v302_v61, %v301_v59 }
  0xa8   : > { %v298_v0 = vadd.f32 %v297_v62, %v296_v60  ;;  %v304_v1 = vrot.slane %v303_v63, 1 }
  0xaa   : > { %v305_v2 = vadd.f32 %v304_v1, %v303_v63  ;;  %v306_v3 = vmul.f32 1.442695, %v298_v0 }
  0xac   : > { %558 = vpow2.f32 %v306_v3  ;;  %v308_v4 = vmul.f32 1.442695, %v305_v2 }
  0xae   : > { %560 = vpow2.f32 %v308_v4 }
  0xb6   : > { %v559_v5 = vpop.eup %558 }
  0xb7   : > { %v310_v6 = vsub.f32 1.0, %v559_v5 }
  0xb8   : > { %v561_v9 = vpop.eup %560 }
  0xb9   : > { %v311_v10 = vsub.f32 1.0, %v561_v9  ;;  %v312_v11 = vmul.f32 %v310_v6, %v310_v6 }
  0xbb   : > { %v313_v12 = vmul.f32 %v311_v10, %v311_v10  ;;  %v314_v13 = vmul.f32 %v312_v11, %v298_v0 }
  0xbd   : > { %v315_v15 = vmul.f32 %v313_v12, %v305_v2  ;;  %v316_v16 = vsub.f32 0.0, %v314_v13 }
  0xbf   : > { %v317_v17 = vsub.f32 0.0, %v315_v15 }
  0xc1   : > { %v321_v19 = vcombine.low %v316_v16, %v317_v17 }
  0xc3   : > { %v328_v20 = vrot.slane %v321_v19, %v327_v18  ;;  %344 = sbr.rel (!%p212_p9) target bundleno = 357 (0x165), region = 44 }
  0xc5   : > { %v335_v22 = vrot.slane %v328_v20, %v327_v18 }
  0xc7   : > { %v337_v23 = vadd.f32 %v335_v22, %v318_v21 }
  0xc9   : > { %342 = vst.msk [vmem:[#allocation2] sm:$0x3] %vm340_vm4, %v337_v23 }
  0xd0   : > { %v345_v24 = vld [vmem:[#allocation2] sm:$0x3] }
  0xd1   : > { %v350_v25 = vrot.slane %v345_v24, %v279_v39  ;;  %v354_v26 = vrot.slane %v345_v24, %v283_v42 }
  0xd3   : > { %v358_v27 = vsel %vm357_vm5, %v350_v25, 0.0  ;;  %v359_v28 = vsel %vm357_vm5, %v354_v26, 0.0 }
  0xd4   : > { %v360_v29 = vadd.f32 %v359_v28, %v358_v27 }
  0xd6   : > { %361 = vadd.xlane.f32.xlu0 %v360_v29 }
 0x163   : > { %v362_v30 = vpop.xlane.xlu0 %361 }
 0x164   : > { %364 = vst.msk [vmem:[#allocation8] sm:$0x1] %vm363_vm6, %v362_v30 }
 0x165 PF: > { %p888_p6 = scmp.eq.s32.totalorder %s460_s15, 1  ;;  %s712_s12 = smov [#allocation8]  }
 0x166   : > { %s372_s24 = sshll.u32 %s712_s12, 4  ;;  %s373_s24 = int_to_ptr.vmem [resolvable:$true] %s372_s24 }
 0x167   : > { %s622_s5 = scalar_lea.vmem %s373_s24, 16  ;;  %s628_s7 = scalar_lea.vmem %s373_s24, 32 }
 0x168   : > { %p623_p2 = scmp.ne.s32.totalorder %s373_s24, %s622_s5  ;;  %p629_p1 = scmp.lt.s32.totalorder %s373_s24, %s373_s24 }
 0x169   : > { %p630_p5 = scmp.lt.s32.totalorder %s628_s7, %s622_s5 }
 0x16a   : > { %p624_p3 = pnand %p623_p2, %p888_p6 }
 0x16b   : > { %p631_p10 = por %p630_p5, %p629_p1 }
 0x16c   : > { %p625_p4 = pneg %p624_p3 }
 0x16e   : > { %p632_p11 = pnand %p631_p10, %p625_p4 }
 0x170   : > { %635 = shalt.err (!%p632_p11)
}
 0x171   : > { %s636_s8 = scalar_lea.hbm %s934_s2, 16 }
 0x172   : > { %p637_p0 = scmp.ne.s32.totalorder %s934_s2, %s636_s8  ;;  %p642_p13 = scmp.lt.u32.totalorder %s636_s8, %s934_s2 }
 0x174   : > { %p638_p12 = pnand %p637_p0, %p888_p6 }
 0x176   : > { %p639_p8 = pneg %p638_p12 }
 0x178   : > { %p644_p7 = pnand %p642_p13, %p639_p8 }
 0x17a   : > { %647 = shalt.err (!%p644_p7)
}
 0x17b   : > { %487 = dma.vmem_to_hbm [thread:$0]  (%p888_p6), %s373_s24, 16, %s934_s2, [#allocation5]  }
 0x17c   : > { %681 = dma.done.wait (%p888_p6), [#allocation5], 16  }
 0x17d   : > { %683 = vsyncadd (%p888_p6), [#allocation5], 4294967280 }
 0x17e PF: > { %s19_s14 = sadd.s32 1, %s706_s14   ;;  %s945_s9 = smov %s690_s10 }
 0x17f   : > { %p16_p9 = scmp.ge.s32.totalorder %s19_s14, 4   ;;  %s946_s10 = smov %s694_s11 }
 0x180   : > { %s947_s11 = smov %s779_s21  ;;  %s948_s12 = smov %s702_s13 }
 0x181   : > { %s949_s13 = smov %s951_s16  ;;  %18 = sbr.rel (!%p16_p9) target bundleno = 7 (0x7), region = 86 }
 0x188   :  { %385 = vsyncpa [#allocation4], 1 }
 0x189   :  { %387 = vsyncpa [#allocation4 + $0x1], 1 }
 0x18a   :  { %388 = vsyncpa [#allocation7], 1 }
 0x18b   :  { %390 = vsyncpa [#allocation7 + $0x1], 1 }
 0x18c   :  { %391 = vsyncpa [#allocation5], 1 }
 0x18d   :  { %393 = vsyncpa [#allocation5 + $0x1], 1 }

</bundles_post_ra>
